<compile_context>
chip_gen: v7x
topology: tpu7x:2x2x1
jax: 0.10.0
libtpu: 0.0.40
codegen_flags: <defaults>
</compile_context>

<pallas_src>
import functools

import jax
import jax.numpy as jnp
from jax.experimental import pallas as pl
from jax.experimental.pallas import tpu as pltpu


def _round_up(n, m):
    return ((n + m - 1) // m) * m


def _nf_forward_kernel(xa_ref, xb_ref, w1_ref, b1_ref,
                       w2s_ref, b2s_ref, w2t_ref, b2t_ref,
                       z_ref, ld_ref):
    """One lane-dense batch tile (batch on lanes) through the full flow chain.

    xa_ref, xb_ref : (d, TB)    transposed halves of the input tile
    w1_ref         : (K, H, d)  first layer, pre-transposed (matmul dtype)
    b1_ref         : (K, H, 1)  first-layer bias (f32)
    w2s_ref        : (K, d, H)  second layer, scale head, pre-transposed
    b2s_ref        : (K, d, 1)
    w2t_ref        : (K, d, H)  second layer, shift head, pre-transposed
    b2t_ref        : (K, d, 1)
    z_ref          : (2, d, TB) output latent halves (z[:, :d].T, z[:, d:].T)
    ld_ref         : (1, TB)    accumulated log|det J| per sample (lane-dense)
    """
    mm_dtype = w1_ref.dtype
    a = xa_ref[...]                       # (d, TB)  == x[:, :d].T tile
    b = xb_ref[...]                       # (d, TB)  == x[:, d:].T tile
    K = w1_ref.shape[0]
    TB = a.shape[1]

    log_det = jnp.zeros((1, TB), jnp.float32)

    # K is small: static unroll.  If K grows past ~8-16, switch to
    # lax.fori_loop(..., unroll=True) over k (dynamic leading weight index)
    # so live ranges stay bounded and vregs do not spill.
    for k in range(K):
        cond = a if (k % 2 == 0) else b

        h = jnp.tanh(
            jnp.dot(w1_ref[k], cond.astype(mm_dtype),
                    preferred_element_type=jnp.float32)
            + b1_ref[k]                                   # (H,1) lane-broadcast
        )                                                 # (H, TB), f32
        h_mm = h.astype(mm_dtype)
        s = jnp.tanh(
            jnp.dot(w2s_ref[k], h_mm, preferred_element_type=jnp.float32)
            + b2s_ref[k]
        )                                                 # (d, TB), f32
        t = (jnp.dot(w2t_ref[k], h_mm, preferred_element_type=jnp.float32)
             + b2t_ref[k])                                # (d, TB), f32

        if k % 2 == 0:
            b = b * jnp.exp(s) + t        # transform the second half
        else:
            a = a * jnp.exp(s) + t        # transform the first half

        log_det = log_det + jnp.sum(s, axis=0, keepdims=True)

    z_ref[0] = a
    z_ref[1] = b
    ld_ref[...] = log_det


@functools.partial(jax.jit, static_argnames=("tb", "matmul_dtype"))
def normalizing_flow_forward(x, w1, b1, w2, b2, *, tb=4096,
                             matmul_dtype=jnp.bfloat16):
    """Returns (z, log_det) matching NormalizingFlowModel.forward semantics.

    x  : (B, D) with D even
    w1 : (K, d, H), b1: (K, H), w2: (K, H, 2d), b2: (K, 2d)  (d = D // 2)

    matmul_dtype: operand dtype for the MXU matmuls (bf16 default; pass
    jnp.float32 for exact f32 semantics).  tanh/exp/log_det are always f32.
    """
    B, D = x.shape
    d = D // 2
    K, _, H = w1.shape

    # ---- host-side layout plumbing (tiny, one-time per call) --------------
    # Batch-on-lanes: weights pre-transposed so the kernel computes
    # h = tanh(w1T[k] @ condT + b1[:,None]), s/t from pre-split heads.
    w1T = jnp.transpose(w1, (0, 2, 1)).astype(matmul_dtype)             # (K,H,d)
    w2sT = jnp.transpose(w2[:, :, :d], (0, 2, 1)).astype(matmul_dtype)  # (K,d,H)
    w2tT = jnp.transpose(w2[:, :, d:], (0, 2, 1)).astype(matmul_dtype)  # (K,d,H)
    b1c = b1[:, :, None].astype(jnp.float32)                            # (K,H,1)
    b2sc = b2[:, :d, None].astype(jnp.float32)                          # (K,d,1)
    b2tc = b2[:, d:, None].astype(jnp.float32)                          # (K,d,1)

    # Batch tile: multiple of 128 lanes, capped at `tb` (default 4096, fine on
    # v5e/v6e/v7x; v5e/v6e can go to 8192).  Also capped at ceil(B/2) rounded
    # up so batches >= ~256 give >= 2 grid steps -> both v7x TensorCores work.
    TB = min(_round_up(tb, 128), _round_up(max((B + 1) // 2, 1), 128))
    Bp = _round_up(B, TB)

    xT = x.astype(jnp.float32).T                                        # (D, B)
    if Bp != B:
        xT = jnp.pad(xT, ((0, 0), (0, Bp - B)))
    xaT, xbT = xT[:d], xT[d:]                                           # (d, Bp)

    grid = (Bp // TB,)

    # ---- padding-aware VMEM budget -----------------------------------------
    LANE, SUB = 128, 8
    w_itemsize = jnp.dtype(matmul_dtype).itemsize

    def _tile_bytes(rows, cols, itemsize):
        return _round_up(max(rows, 1), SUB) * _round_up(max(cols, 1), LANE) * itemsize

    # per-grid-step I/O blocks: xa, xb, z (2 slabs), log_det (all f32)
    io_block = 4 * _tile_bytes(d, TB, 4) + _tile_bytes(1, TB, 4)
    # resident parameter blocks (weights in matmul_dtype, biases f32)
    w_block = (K * _tile_bytes(H, d, w_itemsize)
               + 2 * K * _tile_bytes(d, H, w_itemsize)
               + K * _tile_bytes(H, 1, 4)
               + 2 * K * _tile_bytes(d, 1, 4))
    # in-kernel temporaries per unrolled flow step: h plus a few (d, TB) values
    tmp_bytes = (_round_up(H, SUB) + 8 * _round_up(d, SUB) + 2 * SUB) * TB * 4
    vmem_bytes = 2 * (io_block + w_block) + tmp_bytes + (4 << 20)
    vmem_bytes = int(min(max(vmem_bytes, 16 << 20), 64 << 20))

    act_spec = pl.BlockSpec((d, TB), lambda i: (0, i))
    wfull = lambda shape: pl.BlockSpec(shape, lambda i: (0, 0, 0))

    z_stacked, ld = pl.pallas_call(
        _nf_forward_kernel,
        grid=grid,
        in_specs=[
            act_spec,                 # xaT
            act_spec,                 # xbT
            wfull((K, H, d)),         # w1T   (resident across the grid)
            wfull((K, H, 1)),         # b1
            wfull((K, d, H)),         # w2sT
            wfull((K, d, 1)),         # b2s
            wfull((K, d, H)),         # w2tT
            wfull((K, d, 1)),         # b2t
        ],
        out_specs=(
            pl.BlockSpec((2, d, TB), lambda i: (0, 0, i)),   # stacked z halves
            pl.BlockSpec((1, TB), lambda i: (0, i)),         # lane-dense log_det
        ),
        out_shape=(
            jax.ShapeDtypeStruct((2, d, Bp), jnp.float32),
            jax.ShapeDtypeStruct((1, Bp), jnp.float32),
        ),
        compiler_params=pltpu.CompilerParams(
            dimension_semantics=("parallel",),
            vmem_limit_bytes=vmem_bytes,
        ),
    )(xaT, xbT, w1T, b1c, w2sT, b2sc, w2tT, b2tc)

    # (2, d, Bp) -> (D, Bp) is a contiguous reshape; one transpose back to the
    # module's (B, D) interface (layout plumbing, no concatenate needed).
    z = z_stacked.reshape(D, Bp).T[:B]
    log_det = ld[0, :B]
    return z, log_det


def _reference_forward(x, w1, b1, w2, b2, matmul_dtype=jnp.float32):
    """Pure-JAX reference of the same flow chain (correctness check)."""
    B, D = x.shape
    d = D // 2
    K = w1.shape[0]
    a = x[:, :d].astype(jnp.float32)
    b = x[:, d:].astype(jnp.float32)
    log_det = jnp.zeros((B,), jnp.float32)
    for k in range(K):
        cond = a if (k % 2 == 0) else b
        h = jnp.tanh(
            jnp.dot(cond.astype(matmul_dtype), w1[k].astype(matmul_dtype),
                    preferred_element_type=jnp.float32) + b1[k][None, :])
        st = jnp.dot(h.astype(matmul_dtype), w2[k].astype(matmul_dtype),
                     preferred_element_type=jnp.float32) + b2[k][None, :]
        s = jnp.tanh(st[:, :d])
        t = st[:, d:]
        if k % 2 == 0:
            b = b * jnp.exp(s) + t
        else:
            a = a * jnp.exp(s) + t
        log_det = log_det + jnp.sum(s, axis=1)
    return jnp.concatenate([a, b], axis=1), log_det


if __name__ == "__main__":
    # Small shapes consistent with the module: x is (batch, num_inputs).
    B = 300         # batch (m) — exercises >1 grid step and batch padding
    D = 8           # num_inputs
    d = D // 2
    H = 32          # hidden width of each coupling MLP
    K = 4           # number of flows in the chain

    key = jax.random.PRNGKey(0)
    kx, k1, k2, k3, k4 = jax.random.split(key, 5)

    x = jax.random.normal(kx, (B, D), dtype=jnp.float32)

    # Deterministic synthetic parameters (stacked over flows).
    w1 = 0.2 * jax.random.normal(k1, (K, d, H), dtype=jnp.float32)
    b1 = 0.1 * jax.random.normal(k2, (K, H), dtype=jnp.float32)
    w2 = 0.2 * jax.random.normal(k3, (K, H, 2 * d), dtype=jnp.float32)
    b2 = 0.1 * jax.random.normal(k4, (K, 2 * d), dtype=jnp.float32)

    # Default path: bf16 MXU operands, f32 accumulate / elementwise.
    z, log_det = normalizing_flow_forward(x, w1, b1, w2, b2)
    jax.block_until_ready((z, log_det))

    z_ref_mm, ld_ref_mm = _reference_forward(x, w1, b1, w2, b2, jnp.bfloat16)
    assert jnp.allclose(z, z_ref_mm, atol=1e-2, rtol=1e-2), \
        "latent mismatch vs bf16-matmul reference"
    assert jnp.allclose(log_det, ld_ref_mm, atol=1e-2, rtol=1e-2), \
        "log_det mismatch vs bf16-matmul reference"

    z_ref_f32, ld_ref_f32 = _reference_forward(x, w1, b1, w2, b2, jnp.float32)
    assert jnp.allclose(z, z_ref_f32, atol=5e-2, rtol=5e-2), \
        "latent mismatch vs f32 reference (bf16 path sanity)"
    assert jnp.allclose(log_det, ld_ref_f32, atol=5e-2, rtol=5e-2), \
        "log_det mismatch vs f32 reference (bf16 path sanity)"

    # Exact-f32 path must match the f32 reference tightly.
    z32, ld32 = normalizing_flow_forward(x, w1, b1, w2, b2,
                                         matmul_dtype=jnp.float32)
    jax.block_until_ready((z32, ld32))
    assert jnp.allclose(z32, z_ref_f32, atol=1e-4, rtol=1e-4), \
        "latent mismatch vs f32 reference (f32 path)"
    assert jnp.allclose(ld32, ld_ref_f32, atol=1e-4, rtol=1e-4), \
        "log_det mismatch vs f32 reference (f32 path)"

    # TODO(synk): inverse()/log_probs()/sample() (prior MVN log-prob) are not
    # part of forward() and are not implemented here.
    print("KERNEL_OK")
</pallas_src>

<mosaic_0001>
module attributes {stable_mosaic.version = 11 : i64} {
  func.func @_nf_forward_kernel(%arg0: i32, %arg1: memref<4x256xf32, #tpu.memory_space<vmem>>, %arg2: memref<4x256xf32, #tpu.memory_space<vmem>>, %arg3: memref<4x32x4xbf16, #tpu.memory_space<vmem>>, %arg4: memref<4x32x1xf32, #tpu.memory_space<vmem>>, %arg5: memref<4x4x32xbf16, #tpu.memory_space<vmem>>, %arg6: memref<4x4x1xf32, #tpu.memory_space<vmem>>, %arg7: memref<4x4x32xbf16, #tpu.memory_space<vmem>>, %arg8: memref<4x4x1xf32, #tpu.memory_space<vmem>>, %arg9: memref<2x4x256xf32, #tpu.memory_space<vmem>>, %arg10: memref<1x256xf32, #tpu.memory_space<vmem>>) attributes {dimension_semantics = [#tpu.dimension_semantics<parallel>], iteration_bounds = array<i64: 2>, scalar_prefetch = 0 : i64, scratch_operands = 0 : i64, tpu.core_type = #tpu.core_type<tc>, window_params = [{transform_indices = @transform_0, window_bounds = array<i64: 4, 256>}, {transform_indices = @transform_1, window_bounds = array<i64: 4, 256>}, {pipeline_mode = #tpu.pipeline_mode<synchronous>, transform_indices = @transform_2, window_bounds = array<i64: 4, 32, 4>}, {pipeline_mode = #tpu.pipeline_mode<synchronous>, transform_indices = @transform_3, window_bounds = array<i64: 4, 32, 1>}, {pipeline_mode = #tpu.pipeline_mode<synchronous>, transform_indices = @transform_4, window_bounds = array<i64: 4, 4, 32>}, {pipeline_mode = #tpu.pipeline_mode<synchronous>, transform_indices = @transform_5, window_bounds = array<i64: 4, 4, 1>}, {pipeline_mode = #tpu.pipeline_mode<synchronous>, transform_indices = @transform_6, window_bounds = array<i64: 4, 4, 32>}, {pipeline_mode = #tpu.pipeline_mode<synchronous>, transform_indices = @transform_7, window_bounds = array<i64: 4, 4, 1>}, {transform_indices = @transform_8, window_bounds = array<i64: 2, 4, 256>}, {transform_indices = @transform_9, window_bounds = array<i64: 1, 256>}]} {
    %c0 = arith.constant 0 : index
    %c0_0 = arith.constant 0 : index
    %0 = vector.load %arg1[%c0, %c0_0] : memref<4x256xf32, #tpu.memory_space<vmem>>, vector<4x256xf32>
    %c0_1 = arith.constant 0 : index
    %c0_2 = arith.constant 0 : index
    %1 = vector.load %arg2[%c0_1, %c0_2] : memref<4x256xf32, #tpu.memory_space<vmem>>, vector<4x256xf32>
    %cst = arith.constant 0.000000e+00 : f32
    %2 = vector.broadcast %cst : f32 to vector<1x256xf32>
    %c0_3 = arith.constant 0 : index
    %c0_4 = arith.constant 0 : index
    %c0_5 = arith.constant 0 : index
    %3 = vector.load %arg3[%c0_3, %c0_4, %c0_5] : memref<4x32x4xbf16, #tpu.memory_space<vmem>>, vector<1x32x4xbf16>
    %4 = vector.shape_cast %3 : vector<1x32x4xbf16> to vector<32x4xbf16>
    %5 = arith.truncf %0 : vector<4x256xf32> to vector<4x256xbf16>
    %cst_6 = arith.constant dense<0.000000e+00> : vector<32x256xf32>
    %6 = tpu.matmul %4, %5, %cst_6 {dimension_numbers = #tpu.dot_dimension_numbers<[1], [0], [0], [1], [0, 0, 1, 1], [], []>} : vector<32x4xbf16>, vector<4x256xbf16>, vector<32x256xf32> -> vector<32x256xf32>
    %c0_7 = arith.constant 0 : index
    %c0_8 = arith.constant 0 : index
    %c0_9 = arith.constant 0 : index
    %7 = vector.load %arg4[%c0_7, %c0_8, %c0_9] : memref<4x32x1xf32, #tpu.memory_space<vmem>>, vector<1x32x1xf32>
    %8 = vector.shape_cast %7 : vector<1x32x1xf32> to vector<32x1xf32>
    %9 = vector.broadcast %8 : vector<32x1xf32> to vector<32x256xf32>
    %10 = arith.addf %6, %9 : vector<32x256xf32>
    %11 = math.tanh %10 : vector<32x256xf32>
    %12 = arith.truncf %11 : vector<32x256xf32> to vector<32x256xbf16>
    %c0_10 = arith.constant 0 : index
    %c0_11 = arith.constant 0 : index
    %c0_12 = arith.constant 0 : index
    %13 = vector.load %arg5[%c0_10, %c0_11, %c0_12] : memref<4x4x32xbf16, #tpu.memory_space<vmem>>, vector<1x4x32xbf16>
    %14 = vector.shape_cast %13 : vector<1x4x32xbf16> to vector<4x32xbf16>
    %cst_13 = arith.constant dense<0.000000e+00> : vector<4x256xf32>
    %15 = tpu.matmul %14, %12, %cst_13 {dimension_numbers = #tpu.dot_dimension_numbers<[1], [0], [0], [1], [0, 0, 1, 1], [], []>} : vector<4x32xbf16>, vector<32x256xbf16>, vector<4x256xf32> -> vector<4x256xf32>
    %c0_14 = arith.constant 0 : index
    %c0_15 = arith.constant 0 : index
    %c0_16 = arith.constant 0 : index
    %16 = vector.load %arg6[%c0_14, %c0_15, %c0_16] : memref<4x4x1xf32, #tpu.memory_space<vmem>>, vector<1x4x1xf32>
    %17 = vector.shape_cast %16 : vector<1x4x1xf32> to vector<4x1xf32>
    %18 = vector.broadcast %17 : vector<4x1xf32> to vector<4x256xf32>
    %19 = arith.addf %15, %18 : vector<4x256xf32>
    %20 = math.tanh %19 : vector<4x256xf32>
    %c0_17 = arith.constant 0 : index
    %c0_18 = arith.constant 0 : index
    %c0_19 = arith.constant 0 : index
    %21 = vector.load %arg7[%c0_17, %c0_18, %c0_19] : memref<4x4x32xbf16, #tpu.memory_space<vmem>>, vector<1x4x32xbf16>
    %22 = vector.shape_cast %21 : vector<1x4x32xbf16> to vector<4x32xbf16>
    %cst_20 = arith.constant dense<0.000000e+00> : vector<4x256xf32>
    %23 = tpu.matmul %22, %12, %cst_20 {dimension_numbers = #tpu.dot_dimension_numbers<[1], [0], [0], [1], [0, 0, 1, 1], [], []>} : vector<4x32xbf16>, vector<32x256xbf16>, vector<4x256xf32> -> vector<4x256xf32>
    %c0_21 = arith.constant 0 : index
    %c0_22 = arith.constant 0 : index
    %c0_23 = arith.constant 0 : index
    %24 = vector.load %arg8[%c0_21, %c0_22, %c0_23] : memref<4x4x1xf32, #tpu.memory_space<vmem>>, vector<1x4x1xf32>
    %25 = vector.shape_cast %24 : vector<1x4x1xf32> to vector<4x1xf32>
    %26 = vector.broadcast %25 : vector<4x1xf32> to vector<4x256xf32>
    %27 = arith.addf %23, %26 : vector<4x256xf32>
    %28 = math.exp %20 : vector<4x256xf32>
    %29 = arith.mulf %1, %28 : vector<4x256xf32>
    %30 = arith.addf %29, %27 : vector<4x256xf32>
    %cst_24 = arith.constant dense<0.000000e+00> : vector<256xf32>
    %31 = vector.multi_reduction <add>, %20, %cst_24 [0] : vector<4x256xf32> to vector<256xf32>
    %32 = vector.shape_cast %31 : vector<256xf32> to vector<1x256xf32>
    %33 = arith.addf %2, %32 : vector<1x256xf32>
    %c1 = arith.constant 1 : index
    %c0_25 = arith.constant 0 : index
    %c0_26 = arith.constant 0 : index
    %34 = vector.load %arg3[%c1, %c0_25, %c0_26] : memref<4x32x4xbf16, #tpu.memory_space<vmem>>, vector<1x32x4xbf16>
    %35 = vector.shape_cast %34 : vector<1x32x4xbf16> to vector<32x4xbf16>
    %36 = arith.truncf %30 : vector<4x256xf32> to vector<4x256xbf16>
    %cst_27 = arith.constant dense<0.000000e+00> : vector<32x256xf32>
    %37 = tpu.matmul %35, %36, %cst_27 {dimension_numbers = #tpu.dot_dimension_numbers<[1], [0], [0], [1], [0, 0, 1, 1], [], []>} : vector<32x4xbf16>, vector<4x256xbf16>, vector<32x256xf32> -> vector<32x256xf32>
    %c1_28 = arith.constant 1 : index
    %c0_29 = arith.constant 0 : index
    %c0_30 = arith.constant 0 : index
    %38 = vector.load %arg4[%c1_28, %c0_29, %c0_30] : memref<4x32x1xf32, #tpu.memory_space<vmem>>, vector<1x32x1xf32>
    %39 = vector.shape_cast %38 : vector<1x32x1xf32> to vector<32x1xf32>
    %40 = vector.broadcast %39 : vector<32x1xf32> to vector<32x256xf32>
    %41 = arith.addf %37, %40 : vector<32x256xf32>
    %42 = math.tanh %41 : vector<32x256xf32>
    %43 = arith.truncf %42 : vector<32x256xf32> to vector<32x256xbf16>
    %c1_31 = arith.constant 1 : index
    %c0_32 = arith.constant 0 : index
    %c0_33 = arith.constant 0 : index
    %44 = vector.load %arg5[%c1_31, %c0_32, %c0_33] : memref<4x4x32xbf16, #tpu.memory_space<vmem>>, vector<1x4x32xbf16>
    %45 = vector.shape_cast %44 : vector<1x4x32xbf16> to vector<4x32xbf16>
    %cst_34 = arith.constant dense<0.000000e+00> : vector<4x256xf32>
    %46 = tpu.matmul %45, %43, %cst_34 {dimension_numbers = #tpu.dot_dimension_numbers<[1], [0], [0], [1], [0, 0, 1, 1], [], []>} : vector<4x32xbf16>, vector<32x256xbf16>, vector<4x256xf32> -> vector<4x256xf32>
    %c1_35 = arith.constant 1 : index
    %c0_36 = arith.constant 0 : index
    %c0_37 = arith.constant 0 : index
    %47 = vector.load %arg6[%c1_35, %c0_36, %c0_37] : memref<4x4x1xf32, #tpu.memory_space<vmem>>, vector<1x4x1xf32>
    %48 = vector.shape_cast %47 : vector<1x4x1xf32> to vector<4x1xf32>
    %49 = vector.broadcast %48 : vector<4x1xf32> to vector<4x256xf32>
    %50 = arith.addf %46, %49 : vector<4x256xf32>
    %51 = math.tanh %50 : vector<4x256xf32>
    %c1_38 = arith.constant 1 : index
    %c0_39 = arith.constant 0 : index
    %c0_40 = arith.constant 0 : index
    %52 = vector.load %arg7[%c1_38, %c0_39, %c0_40] : memref<4x4x32xbf16, #tpu.memory_space<vmem>>, vector<1x4x32xbf16>
    %53 = vector.shape_cast %52 : vector<1x4x32xbf16> to vector<4x32xbf16>
    %cst_41 = arith.constant dense<0.000000e+00> : vector<4x256xf32>
    %54 = tpu.matmul %53, %43, %cst_41 {dimension_numbers = #tpu.dot_dimension_numbers<[1], [0], [0], [1], [0, 0, 1, 1], [], []>} : vector<4x32xbf16>, vector<32x256xbf16>, vector<4x256xf32> -> vector<4x256xf32>
    %c1_42 = arith.constant 1 : index
    %c0_43 = arith.constant 0 : index
    %c0_44 = arith.constant 0 : index
    %55 = vector.load %arg8[%c1_42, %c0_43, %c0_44] : memref<4x4x1xf32, #tpu.memory_space<vmem>>, vector<1x4x1xf32>
    %56 = vector.shape_cast %55 : vector<1x4x1xf32> to vector<4x1xf32>
    %57 = vector.broadcast %56 : vector<4x1xf32> to vector<4x256xf32>
    %58 = arith.addf %54, %57 : vector<4x256xf32>
    %59 = math.exp %51 : vector<4x256xf32>
    %60 = arith.mulf %0, %59 : vector<4x256xf32>
    %61 = arith.addf %60, %58 : vector<4x256xf32>
    %cst_45 = arith.constant dense<0.000000e+00> : vector<256xf32>
    %62 = vector.multi_reduction <add>, %51, %cst_45 [0] : vector<4x256xf32> to vector<256xf32>
    %63 = vector.shape_cast %62 : vector<256xf32> to vector<1x256xf32>
    %64 = arith.addf %33, %63 : vector<1x256xf32>
    %c2 = arith.constant 2 : index
    %c0_46 = arith.constant 0 : index
    %c0_47 = arith.constant 0 : index
    %65 = vector.load %arg3[%c2, %c0_46, %c0_47] : memref<4x32x4xbf16, #tpu.memory_space<vmem>>, vector<1x32x4xbf16>
    %66 = vector.shape_cast %65 : vector<1x32x4xbf16> to vector<32x4xbf16>
    %67 = arith.truncf %61 : vector<4x256xf32> to vector<4x256xbf16>
    %cst_48 = arith.constant dense<0.000000e+00> : vector<32x256xf32>
    %68 = tpu.matmul %66, %67, %cst_48 {dimension_numbers = #tpu.dot_dimension_numbers<[1], [0], [0], [1], [0, 0, 1, 1], [], []>} : vector<32x4xbf16>, vector<4x256xbf16>, vector<32x256xf32> -> vector<32x256xf32>
    %c2_49 = arith.constant 2 : index
    %c0_50 = arith.constant 0 : index
    %c0_51 = arith.constant 0 : index
    %69 = vector.load %arg4[%c2_49, %c0_50, %c0_51] : memref<4x32x1xf32, #tpu.memory_space<vmem>>, vector<1x32x1xf32>
    %70 = vector.shape_cast %69 : vector<1x32x1xf32> to vector<32x1xf32>
    %71 = vector.broadcast %70 : vector<32x1xf32> to vector<32x256xf32>
    %72 = arith.addf %68, %71 : vector<32x256xf32>
    %73 = math.tanh %72 : vector<32x256xf32>
    %74 = arith.truncf %73 : vector<32x256xf32> to vector<32x256xbf16>
    %c2_52 = arith.constant 2 : index
    %c0_53 = arith.constant 0 : index
    %c0_54 = arith.constant 0 : index
    %75 = vector.load %arg5[%c2_52, %c0_53, %c0_54] : memref<4x4x32xbf16, #tpu.memory_space<vmem>>, vector<1x4x32xbf16>
    %76 = vector.shape_cast %75 : vector<1x4x32xbf16> to vector<4x32xbf16>
    %cst_55 = arith.constant dense<0.000000e+00> : vector<4x256xf32>
    %77 = tpu.matmul %76, %74, %cst_55 {dimension_numbers = #tpu.dot_dimension_numbers<[1], [0], [0], [1], [0, 0, 1, 1], [], []>} : vector<4x32xbf16>, vector<32x256xbf16>, vector<4x256xf32> -> vector<4x256xf32>
    %c2_56 = arith.constant 2 : index
    %c0_57 = arith.constant 0 : index
    %c0_58 = arith.constant 0 : index
    %78 = vector.load %arg6[%c2_56, %c0_57, %c0_58] : memref<4x4x1xf32, #tpu.memory_space<vmem>>, vector<1x4x1xf32>
    %79 = vector.shape_cast %78 : vector<1x4x1xf32> to vector<4x1xf32>
    %80 = vector.broadcast %79 : vector<4x1xf32> to vector<4x256xf32>
    %81 = arith.addf %77, %80 : vector<4x256xf32>
    %82 = math.tanh %81 : vector<4x256xf32>
    %c2_59 = arith.constant 2 : index
    %c0_60 = arith.constant 0 : index
    %c0_61 = arith.constant 0 : index
    %83 = vector.load %arg7[%c2_59, %c0_60, %c0_61] : memref<4x4x32xbf16, #tpu.memory_space<vmem>>, vector<1x4x32xbf16>
    %84 = vector.shape_cast %83 : vector<1x4x32xbf16> to vector<4x32xbf16>
    %cst_62 = arith.constant dense<0.000000e+00> : vector<4x256xf32>
    %85 = tpu.matmul %84, %74, %cst_62 {dimension_numbers = #tpu.dot_dimension_numbers<[1], [0], [0], [1], [0, 0, 1, 1], [], []>} : vector<4x32xbf16>, vector<32x256xbf16>, vector<4x256xf32> -> vector<4x256xf32>
    %c2_63 = arith.constant 2 : index
    %c0_64 = arith.constant 0 : index
    %c0_65 = arith.constant 0 : index
    %86 = vector.load %arg8[%c2_63, %c0_64, %c0_65] : memref<4x4x1xf32, #tpu.memory_space<vmem>>, vector<1x4x1xf32>
    %87 = vector.shape_cast %86 : vector<1x4x1xf32> to vector<4x1xf32>
    %88 = vector.broadcast %87 : vector<4x1xf32> to vector<4x256xf32>
    %89 = arith.addf %85, %88 : vector<4x256xf32>
    %90 = math.exp %82 : vector<4x256xf32>
    %91 = arith.mulf %30, %90 : vector<4x256xf32>
    %92 = arith.addf %91, %89 : vector<4x256xf32>
    %cst_66 = arith.constant dense<0.000000e+00> : vector<256xf32>
    %93 = vector.multi_reduction <add>, %82, %cst_66 [0] : vector<4x256xf32> to vector<256xf32>
    %94 = vector.shape_cast %93 : vector<256xf32> to vector<1x256xf32>
    %95 = arith.addf %64, %94 : vector<1x256xf32>
    %c3 = arith.constant 3 : index
    %c0_67 = arith.constant 0 : index
    %c0_68 = arith.constant 0 : index
    %96 = vector.load %arg3[%c3, %c0_67, %c0_68] : memref<4x32x4xbf16, #tpu.memory_space<vmem>>, vector<1x32x4xbf16>
    %97 = vector.shape_cast %96 : vector<1x32x4xbf16> to vector<32x4xbf16>
    %98 = arith.truncf %92 : vector<4x256xf32> to vector<4x256xbf16>
    %cst_69 = arith.constant dense<0.000000e+00> : vector<32x256xf32>
    %99 = tpu.matmul %97, %98, %cst_69 {dimension_numbers = #tpu.dot_dimension_numbers<[1], [0], [0], [1], [0, 0, 1, 1], [], []>} : vector<32x4xbf16>, vector<4x256xbf16>, vector<32x256xf32> -> vector<32x256xf32>
    %c3_70 = arith.constant 3 : index
    %c0_71 = arith.constant 0 : index
    %c0_72 = arith.constant 0 : index
    %100 = vector.load %arg4[%c3_70, %c0_71, %c0_72] : memref<4x32x1xf32, #tpu.memory_space<vmem>>, vector<1x32x1xf32>
    %101 = vector.shape_cast %100 : vector<1x32x1xf32> to vector<32x1xf32>
    %102 = vector.broadcast %101 : vector<32x1xf32> to vector<32x256xf32>
    %103 = arith.addf %99, %102 : vector<32x256xf32>
    %104 = math.tanh %103 : vector<32x256xf32>
    %105 = arith.truncf %104 : vector<32x256xf32> to vector<32x256xbf16>
    %c3_73 = arith.constant 3 : index
    %c0_74 = arith.constant 0 : index
    %c0_75 = arith.constant 0 : index
    %106 = vector.load %arg5[%c3_73, %c0_74, %c0_75] : memref<4x4x32xbf16, #tpu.memory_space<vmem>>, vector<1x4x32xbf16>
    %107 = vector.shape_cast %106 : vector<1x4x32xbf16> to vector<4x32xbf16>
    %cst_76 = arith.constant dense<0.000000e+00> : vector<4x256xf32>
    %108 = tpu.matmul %107, %105, %cst_76 {dimension_numbers = #tpu.dot_dimension_numbers<[1], [0], [0], [1], [0, 0, 1, 1], [], []>} : vector<4x32xbf16>, vector<32x256xbf16>, vector<4x256xf32> -> vector<4x256xf32>
    %c3_77 = arith.constant 3 : index
    %c0_78 = arith.constant 0 : index
    %c0_79 = arith.constant 0 : index
    %109 = vector.load %arg6[%c3_77, %c0_78, %c0_79] : memref<4x4x1xf32, #tpu.memory_space<vmem>>, vector<1x4x1xf32>
    %110 = vector.shape_cast %109 : vector<1x4x1xf32> to vector<4x1xf32>
    %111 = vector.broadcast %110 : vector<4x1xf32> to vector<4x256xf32>
    %112 = arith.addf %108, %111 : vector<4x256xf32>
    %113 = math.tanh %112 : vector<4x256xf32>
    %c3_80 = arith.constant 3 : index
    %c0_81 = arith.constant 0 : index
    %c0_82 = arith.constant 0 : index
    %114 = vector.load %arg7[%c3_80, %c0_81, %c0_82] : memref<4x4x32xbf16, #tpu.memory_space<vmem>>, vector<1x4x32xbf16>
    %115 = vector.shape_cast %114 : vector<1x4x32xbf16> to vector<4x32xbf16>
    %cst_83 = arith.constant dense<0.000000e+00> : vector<4x256xf32>
    %116 = tpu.matmul %115, %105, %cst_83 {dimension_numbers = #tpu.dot_dimension_numbers<[1], [0], [0], [1], [0, 0, 1, 1], [], []>} : vector<4x32xbf16>, vector<32x256xbf16>, vector<4x256xf32> -> vector<4x256xf32>
    %c3_84 = arith.constant 3 : index
    %c0_85 = arith.constant 0 : index
    %c0_86 = arith.constant 0 : index
    %117 = vector.load %arg8[%c3_84, %c0_85, %c0_86] : memref<4x4x1xf32, #tpu.memory_space<vmem>>, vector<1x4x1xf32>
    %118 = vector.shape_cast %117 : vector<1x4x1xf32> to vector<4x1xf32>
    %119 = vector.broadcast %118 : vector<4x1xf32> to vector<4x256xf32>
    %120 = arith.addf %116, %119 : vector<4x256xf32>
    %121 = math.exp %113 : vector<4x256xf32>
    %122 = arith.mulf %61, %121 : vector<4x256xf32>
    %123 = arith.addf %122, %120 : vector<4x256xf32>
    %cst_87 = arith.constant dense<0.000000e+00> : vector<256xf32>
    %124 = vector.multi_reduction <add>, %113, %cst_87 [0] : vector<4x256xf32> to vector<256xf32>
    %125 = vector.shape_cast %124 : vector<256xf32> to vector<1x256xf32>
    %126 = arith.addf %95, %125 : vector<1x256xf32>
    %c0_88 = arith.constant 0 : index
    %c0_89 = arith.constant 0 : index
    %c0_90 = arith.constant 0 : index
    %127 = vector.load %arg9[%c0_88, %c0_89, %c0_90] : memref<2x4x256xf32, #tpu.memory_space<vmem>>, vector<1x4x256xf32>
    %128 = vector.shape_cast %127 : vector<1x4x256xf32> to vector<4x256xf32>
    %129 = vector.shape_cast %123 : vector<4x256xf32> to vector<1x4x256xf32>
    tpu.vector_store %arg9[%c0_88, %c0_89, %c0_90], %129 {strides = array<i32>} : memref<2x4x256xf32, #tpu.memory_space<vmem>>, vector<1x4x256xf32>,
    %c1_91 = arith.constant 1 : index
    %c0_92 = arith.constant 0 : index
    %c0_93 = arith.constant 0 : index
    %130 = vector.load %arg9[%c1_91, %c0_92, %c0_93] : memref<2x4x256xf32, #tpu.memory_space<vmem>>, vector<1x4x256xf32>
    %131 = vector.shape_cast %130 : vector<1x4x256xf32> to vector<4x256xf32>
    %132 = vector.shape_cast %92 : vector<4x256xf32> to vector<1x4x256xf32>
    tpu.vector_store %arg9[%c1_91, %c0_92, %c0_93], %132 {strides = array<i32>} : memref<2x4x256xf32, #tpu.memory_space<vmem>>, vector<1x4x256xf32>,
    %c0_94 = arith.constant 0 : index
    %c0_95 = arith.constant 0 : index
    %133 = vector.load %arg10[%c0_94, %c0_95] : memref<1x256xf32, #tpu.memory_space<vmem>>, vector<1x256xf32>
    tpu.vector_store %arg10[%c0_94, %c0_95], %126 {strides = array<i32>} : memref<1x256xf32, #tpu.memory_space<vmem>>, vector<1x256xf32>,
    return
  }
  func.func @transform_0(%arg0: i32) -> (i32, i32) {
    %c0_i32 = arith.constant 0 : i32
    %c0_i32_0 = arith.constant 0 : i32
    return %c0_i32, %arg0 : i32, i32
  }
  func.func @transform_1(%arg0: i32) -> (i32, i32) {
    %c0_i32 = arith.constant 0 : i32
    %c0_i32_0 = arith.constant 0 : i32
    return %c0_i32, %arg0 : i32, i32
  }
  func.func @transform_2(%arg0: i32) -> (i32, i32, i32) {
    %c0_i32 = arith.constant 0 : i32
    %c0_i32_0 = arith.constant 0 : i32
    %c0_i32_1 = arith.constant 0 : i32
    %c0_i32_2 = arith.constant 0 : i32
    return %c0_i32, %c0_i32_0, %c0_i32_1 : i32, i32, i32
  }
  func.func @transform_3(%arg0: i32) -> (i32, i32, i32) {
    %c0_i32 = arith.constant 0 : i32
    %c0_i32_0 = arith.constant 0 : i32
    %c0_i32_1 = arith.constant 0 : i32
    %c0_i32_2 = arith.constant 0 : i32
    return %c0_i32, %c0_i32_0, %c0_i32_1 : i32, i32, i32
  }
  func.func @transform_4(%arg0: i32) -> (i32, i32, i32) {
    %c0_i32 = arith.constant 0 : i32
    %c0_i32_0 = arith.constant 0 : i32
    %c0_i32_1 = arith.constant 0 : i32
    %c0_i32_2 = arith.constant 0 : i32
    return %c0_i32, %c0_i32_0, %c0_i32_1 : i32, i32, i32
  }
  func.func @transform_5(%arg0: i32) -> (i32, i32, i32) {
    %c0_i32 = arith.constant 0 : i32
    %c0_i32_0 = arith.constant 0 : i32
    %c0_i32_1 = arith.constant 0 : i32
    %c0_i32_2 = arith.constant 0 : i32
    return %c0_i32, %c0_i32_0, %c0_i32_1 : i32, i32, i32
  }
  func.func @transform_6(%arg0: i32) -> (i32, i32, i32) {
    %c0_i32 = arith.constant 0 : i32
    %c0_i32_0 = arith.constant 0 : i32
    %c0_i32_1 = arith.constant 0 : i32
    %c0_i32_2 = arith.constant 0 : i32
    return %c0_i32, %c0_i32_0, %c0_i32_1 : i32, i32, i32
  }
  func.func @transform_7(%arg0: i32) -> (i32, i32, i32) {
    %c0_i32 = arith.constant 0 : i32
    %c0_i32_0 = arith.constant 0 : i32
    %c0_i32_1 = arith.constant 0 : i32
    %c0_i32_2 = arith.constant 0 : i32
    return %c0_i32, %c0_i32_0, %c0_i32_1 : i32, i32, i32
  }
  func.func @transform_8(%arg0: i32) -> (i32, i32, i32) {
    %c0_i32 = arith.constant 0 : i32
    %c0_i32_0 = arith.constant 0 : i32
    %c0_i32_1 = arith.constant 0 : i32
    return %c0_i32, %c0_i32_0, %arg0 : i32, i32, i32
  }
  func.func @transform_9(%arg0: i32) -> (i32, i32) {
    %c0_i32 = arith.constant 0 : i32
    %c0_i32_0 = arith.constant 0 : i32
    return %c0_i32, %arg0 : i32, i32
  }
}

</mosaic_0001>

<bundles_post_ra>
// kernel: normalizing_flow_forward.1
= control target key start
LH: loop header
LB: loop body
LE: loop exit
PB: predicated region body
PF: predicated region fallthrough
CT: control target
= control target key end

     0   :  { %s1858_s30 = smov 0   ;;  %s1860_s10 = smov 0   ;;  %s2139_s0 = inlined_call_operand.vmem [shape: f32[4,512], index: 0, kind: input, shape index: {}]   ;;  %s2140_s1 = inlined_call_operand.vmem [shape: f32[4,512], index: 1, kind: input, shape index: {}]   ;;  %s2141_s2 = inlined_call_operand.vmem [shape: bf16[4,32,4], index: 2, kind: input, shape index: {}]   ;;  %s2142_s3 = inlined_call_operand.vmem [shape: f32[4,32,1], index: 3, kind: input, shape index: {}]   ;;  %s2143_s4 = inlined_call_operand.vmem [shape: bf16[4,4,32], index: 4, kind: input, shape index: {}]   ;;  %s2144_s5 = inlined_call_operand.vmem [shape: f32[4,4,1], index: 5, kind: input, shape index: {}]   ;;  %s2145_s6 = inlined_call_operand.vmem [shape: bf16[4,4,32], index: 6, kind: input, shape index: {}]   ;;  %s2146_s7 = inlined_call_operand.vmem [shape: f32[4,4,1], index: 7, kind: input, shape index: {}]   ;;  %s2147_s8 = inlined_call_operand.vmem [shape: f32[2,4,512], index: 8, kind: output, shape index: {0}]   ;;  %s2148_s9 = inlined_call_operand.vmem [shape: f32[1,512], index: 9, kind: output, shape index: {1}]  }
   0x1   :  { %s1862_s11 = smov 0  }
   0x2 LB: > { %s1871_s12 = sadd.s32 4294967295, %s1804_s11   ;;  %s1873_s13 = sadd.s32 1, %s1804_s11   ;;  %s1804_s11 = sphi %s1862_s11, %s2152_s11   ;;  %s1800_s10 = sphi %s1860_s10, %s2151_s10   ;;  %s1796_s30 = sphi %s1858_s30, %s2150_s30  }
   0x3   : > { %s202_s14 = ssub.s32 %s1804_s11, %s1873_s13  ;;  %s205_s15 = sadd.s32 1, %s1800_s10 }
   0x4   : > { %p203_p0 = scmp.eq.s32.totalorder %s202_s14, 0  ;;  %p215_p1 = scmp.ne.s32.totalorder %s1800_s10, %s1796_s30 }
   0x5   : > { %p216_p2 = scmp.eq.s32.totalorder %s1871_s12, 1  ;;  %p1571_p3 = scmp.ge.s32.totalorder %s1804_s11, 1 }
   0x6   : > { %s1881_s16 = scalar_select %p203_p0, %s1800_s10, %s205_s15  }
   0x7   : > { %p1883_p4 = por %p216_p2, %p215_p1  ;;  %p302_p5 = scmp.lt.s32.totalorder %s1804_s11, 3 }
   0x9   : > { %p303_p6 = pnand %p1571_p3, %p302_p5 }
   0xa   : > { %s1573_s18 = sshll.u32 (!%p303_p6), %s1871_s12, 1  ;;  %v1806_v0 = vmov (!%p303_p6), 0   ;;  %v376_v1 = vld [vmem:[%s2142_s3] sm:$0xff] (!%p303_p6)  ;;  %v378_v2 = vld [vmem:[%s2142_s3 + $0x10] sm:$0xff] (!%p303_p6)  ;;  %v377_v3 = vld [vmem:[%s2142_s3 + $0x8] sm:$0xff] (!%p303_p6)  ;;  %vm417_vm0 = vcmask (!%p303_p6), 1041408  }
   0xb   : > { %306 = sbr.rel (%p303_p6) target bundleno = 2011 (0x7db), region = 52  ;;  %p347_p7 = scmp.lt.s32.totalorder (!%p303_p6), %s1573_s18, 3  ;;  %456 = vmatprep.mubr.bf16.mxu0 (!%p303_p6), %v1806_v0  ;;  %1675 = vset.pattern.permute.xlu0 (!%p303_p6), %v1806_v0  ;;  %v379_v4 = vld [vmem:[%s2142_s3 + $0x18] sm:$0xff] (!%p303_p6)  ;;  %v490_v8 = vld [vmem:[%s2144_s5] sm:$0xf] (!%p303_p6)  ;;  %vm410_vm1 = vcmask (!%p303_p6), 31744  }
   0xc   : > { %1676 = vset.pattern.permute.xlu1 (!%p303_p6), %v1806_v0  ;;  %532 = vmatprep.mubr.bf16.mxu1 (!%p303_p6), %v1806_v0  ;;  %v544_v9 = vld [vmem:[%s2146_s7] sm:$0xf] (!%p303_p6)  ;;  %v1590_v14 = vld [vmem:[%s2142_s3 + $0x28] sm:$0xff] (!%p303_p6)  ;;  %v1591_v15 = vld [vmem:[%s2142_s3 + $0x30] sm:$0xff] (!%p303_p6)  ;;  %vm496_vm2 = vcmask (!%p303_p6), 261120   ;;  %vm608_vm3 = vcmask (!%p303_p6), 1043456  }
   0xd   : > { %382 = vperm.xlu0 (!%p303_p6), %1675, %v376_v1   ;;  %392 = vperm.xlu1 (!%p303_p6), %1676, %v378_v2   ;;  %v1678_v12 = vld [vmem:[%s2141_s2] sm:$0xff] (!%p303_p6)   ;;  %v1592_v16 = vld [vmem:[%s2142_s3 + $0x38] sm:$0xff] (!%p303_p6)  ;;  %v1679_v17 = vld [vmem:[%s2141_s2 + $0x8] sm:$0xff] (!%p303_p6)   ;;  %s337_s14 = sand.u32 (!%p303_p6), 1, %s1796_s30  }
   0xe   : > { %v1589_v13 = vld [vmem:[%s2142_s3 + $0x20] sm:$0xff] (!%p303_p6)  ;;  %v1609_v21 = vld [vmem:[%s2142_s3 + $0x48] sm:$0xff] (!%p303_p6)  ;;  %v1610_v22 = vld [vmem:[%s2142_s3 + $0x50] sm:$0xff] (!%p303_p6)  ;;  %s1572_s15 = sshll.u32 (!%p303_p6), %s337_s14, 4 }
   0xf   : > { %v1599_v18 = vld [vmem:[%s2144_s5 + $0x4] sm:$0xf] (!%p303_p6)  ;;  %v1611_v23 = vld [vmem:[%s2142_s3 + $0x58] sm:$0xff] (!%p303_p6)  ;;  %v1618_v24 = vld [vmem:[%s2144_s5 + $0x8] sm:$0xf] (!%p303_p6)  ;;  %s2088_s19 = scalar_lea.vmem (!%p303_p6), [#allocation2], %s1572_s15 }
  0x10   : > { %v1602_v19 = vld [vmem:[%s2146_s7 + $0x4] sm:$0xf] (!%p303_p6)  ;;  %v1621_v25 = vld [vmem:[%s2146_s7 + $0x8] sm:$0xf] (!%p303_p6)  ;;  %v1629_v28 = vld [vmem:[%s2142_s3 + $0x70] sm:$0xff] (!%p303_p6) }
  0x11   : > { %387 = vperm.xlu0 (!%p303_p6), %1675, %v377_v3   ;;  %397 = vperm.xlu1 (!%p303_p6), %1676, %v379_v4   ;;  %v1608_v20 = vld [vmem:[%s2142_s3 + $0x40] sm:$0xff] (!%p303_p6)  ;;  %v1628_v27 = vld [vmem:[%s2142_s3 + $0x68] sm:$0xff] (!%p303_p6)  ;;  %v1630_v29 = vld [vmem:[%s2142_s3 + $0x78] sm:$0xff] (!%p303_p6) }
  0x12   : > { %s2154_s18 = smov (!%p347_p7, %s1573_s18), 3  ;;  %v1627_v26 = vld [vmem:[%s2142_s3 + $0x60] sm:$0xff]  ;;  %v1637_v30 = vld [vmem:[%s2144_s5 + $0xc] sm:$0xf] }
  0x13   : > { %s1574_s25 = sshll.u32 %s2154_s18, 2  ;;  %v1640_v31 = vld [vmem:[%s2146_s7 + $0xc] sm:$0xf]  ;;  %v489_v1 = vld [vmem:[%s2143_s4] sm:$0x3] }
  0x14   : > { %s350_s11 = scalar_lea.vmem %s2139_s0, %s1574_s25  ;;  %v543_v2 = vld [vmem:[%s2145_s6] sm:$0x3]  ;;  %s356_s29 = scalar_lea.vmem %s2140_s1, %s1574_s25 }
  0x15   : > { %v1912_v5 = vld [vmem:[%s350_s11] sm:$0xff]  ;;  %493 = vperm.xlu0 %1675, %v490_v8   ;;  %547 = vperm.xlu1 %1676, %v544_v9   ;;  %s362_s11 = scalar_lea.vmem %s2148_s9, %s2154_s18  ;;  %s1648_s25 = sshll.u32 (%p1883_p4), %s1871_s12, 3 }
  0x16   : > { %v372_v6 = vcombine.high %v1912_v5, %v1912_v5  ;;  %v374_v7 = vpack.c.bf16 %v1912_v5, %v1912_v5  ;;  %s1444_s30 = scalar_lea.vmem (%p1883_p4), %s2147_s8, %s1648_s25 }
  0x18   : > { %v375_v10 = vpack.c.bf16 %v372_v6, %v372_v6  ;;  %v419_v11 = vsel %vm417_vm0, %v374_v7, 0 }
  0x19   : > { %642 = vperm.xlu0 %1675, %v1589_v13   ;;  %647 = vperm.xlu1 %1676, %v1590_v14  }
  0x1a   : > { %1580 = vmatprep.subr.msk.bf16.mxu0 %vm417_vm0, %v375_v10 }
  0x1b   : > { %425 = vmatpush1.bf16.msra.mxu0 %v419_v11 }
  0x1d   : > { %652 = vperm.xlu0 %1675, %v1591_v15   ;;  %657 = vperm.xlu1 %1676, %v1592_v16  }
  0x1e   : > { %1581 = vmatmul.mubr.msk.bf16.vlgmr.msra.gmra.mrb[0].mxu0 %vm410_vm1, %v1678_v12 }
  0x1f   : > { %466 = vmatprep.mubr.bf16.mxu0 %v1806_v0 }
  0x21   : > { %753 = vperm.xlu0 %1675, %v1599_v18   ;;  %808 = vperm.xlu1 %1676, %v1602_v19  }
  0x25   : > { %902 = vperm.xlu0 %1675, %v1608_v20   ;;  %907 = vperm.xlu1 %1676, %v1609_v21  }
  0x26   : > { %1582 = vmatmul.mubr.msk.bf16.gmra.mrb[4].mxu0 %vm410_vm1, %v1679_v17 }
  0x27   : > { %714 = vmatprep.mubr.bf16.mxu0 %v1806_v0 }
  0x29   : > { %912 = vperm.xlu0 %1675, %v1610_v22   ;;  %917 = vperm.xlu1 %1676, %v1611_v23  }
  0x2d   : > { %1013 = vperm.xlu0 %1675, %v1618_v24   ;;  %1068 = vperm.xlu1 %1676, %v1621_v25   ;;  %v366_v25 = vld [vmem:[%s356_s29] sm:$0xff] }
  0x31   : > { %1162 = vperm.xlu0 %1675, %v1627_v26   ;;  %1167 = vperm.xlu1 %1676, %v1628_v27  }
  0x35   : > { %1172 = vperm.xlu0 %1675, %v1629_v28   ;;  %1177 = vperm.xlu1 %1676, %v1630_v29  }
  0x39   : > { %1273 = vperm.xlu0 %1675, %v1637_v30   ;;  %1328 = vperm.xlu1 %1676, %v1640_v31  }
  0x8c   : > { %v383_v32 = vpop.permute.xlu0 %382  ;;  %v393_v41 = vpop.permute.xlu1 %392 }
  0x90   : > { %v388_v36 = vpop.permute.xlu0 %387  ;;  %v398_v46 = vpop.permute.xlu1 %397 }
  0x94   : > { %v494_v3 = vpop.permute.xlu0 %493  ;;  %v548_v11 = vpop.permute.xlu1 %547 }
  0xf1   : > { %v458_v33 = vpop.f32.mrb[0].mxu0 }
  0xf2   : > { %v459_v34 = vadd.f32 %v458_v33, %v383_v32  ;;  %v460_v35 = vpop.f32.mrb[1].mxu0  ;;  %v1680_v33 = vld [vmem:[%s2141_s2 + $0x10] sm:$0xff]  }
  0xf3   : > { %v461_v37 = vadd.f32 %v460_v35, %v383_v32  ;;  %v462_v38 = vpop.f32.mrb[2].mxu0  ;;  %v643_v35 = vpop.permute.xlu0 %642 }
  0xf4   : > { %1686 = vtanh.f32 %v459_v34  ;;  %v463_v39 = vadd.f32 %v462_v38, %v388_v36  ;;  %v464_v40 = vpop.f32.mrb[3].mxu0  ;;  %v1681_v34 = vld [vmem:[%s2141_s2 + $0x18] sm:$0xff]  }
  0xf5   : > { %1688 = vtanh.f32 %v461_v37  ;;  %v465_v42 = vadd.f32 %v464_v40, %v388_v36 }
  0xf6   : > { %1690 = vtanh.f32 %v463_v39  ;;  %v648_v39 = vpop.permute.xlu1 %647 }
  0xf7   : > { %1692 = vtanh.f32 %v465_v42 }
  0xf9   : > { %v468_v43 = vpop.f32.mrb[4].mxu0 }
  0xfa   : > { %v469_v44 = vadd.f32 %v468_v43, %v393_v41  ;;  %v470_v45 = vpop.f32.mrb[5].mxu0 }
  0xfb   : > { %v471_v47 = vadd.f32 %v470_v45, %v393_v41  ;;  %v472_v48 = vpop.f32.mrb[6].mxu0  ;;  %v653_v45 = vpop.permute.xlu0 %652 }
  0xfc   : > { %1694 = vtanh.f32 %v469_v44  ;;  %v473_v49 = vadd.f32 %v472_v48, %v398_v46  ;;  %v474_v50 = vpop.f32.mrb[7].mxu0 }
  0xfd   : > { %1696 = vtanh.f32 %v471_v47  ;;  %v475_v51 = vadd.f32 %v474_v50, %v398_v46 }
  0xfe   : > { %v1687_v52 = vpop.eup %1686  ;;  %1698 = vtanh.f32 %v473_v49  ;;  %v658_v49 = vpop.permute.xlu1 %657 }
  0xff   : > { %v1689_v53 = vpop.eup %1688  ;;  %1700 = vtanh.f32 %v475_v51 }
 0x100   : > { %v1691_v54 = vpop.eup %1690 }
 0x101   : > { %v1693_v55 = vpop.eup %1692  ;;  %v485_v56 = vpack.c.bf16 %v1691_v54, %v1687_v52 }
 0x102   : > { %v486_v57 = vpack.c.bf16 %v1693_v55, %v1689_v53 }
 0x104   : > { %500 = vmatprep.subr.bf16.mxu1 %v486_v57 }
 0x105   : > { %501 = vmatpush1.bf16.msra.mxu1 %v485_v56 }
 0x106   : > { %v1695_v58 = vpop.eup %1694 }
 0x107   : > { %v1697_v59 = vpop.eup %1696 }
 0x108   : > { %v1699_v60 = vpop.eup %1698 }
 0x109   : > { %v1701_v61 = vpop.eup %1700  ;;  %v487_v62 = vpack.c.bf16 %v1699_v60, %v1695_v58 }
 0x10a   : > { %v488_v63 = vpack.c.bf16 %v1701_v61, %v1697_v59 }
 0x10c   : > { %502 = vmatprep.subr.bf16.mxu1 %v488_v63 }
 0x10d   : > { %503 = vmatpush1.bf16.msra.mxu1 %v487_v62 }
 0x10e   : > { %553 = vmatprep.subr.bf16.mxu1 %v486_v57 }
 0x110   : > { %1583 = vmatmul.mubr.msk.bf16.vlgmr.msra.gmra.mrb[0].mxu1 %vm496_vm2, %v489_v1 }
 0x111   : > { %554 = vmatpush1.bf16.msra.mxu1 %v485_v56  ;;  %585 = vmatprep.mubr.bf16.mxu1 %v1806_v0 }
 0x112   : > { %555 = vmatprep.subr.bf16.mxu1 %v488_v63 }
 0x115   : > { %556 = vmatpush1.bf16.msra.mxu1 %v487_v62 }
 0x118   : > { %1584 = vmatmul.mubr.msk.bf16.vlgmr.msra.gmra.mrb[4].mxu1 %vm496_vm2, %v543_v2 }
 0x119   : > { %791 = vmatprep.mubr.bf16.mxu1 %v1806_v0 }
 0x1e3   : > { %v534_v4 = vpop.f32.mrb[0].mxu1 }
 0x1e4   : > { %v535_v6 = vadd.f32 %v534_v4, %v494_v3  ;;  %v536_v7 = vpop.f32.mrb[1].mxu1  ;;  %v1598_v4 = vld [vmem:[%s2143_s4 + $0x2] sm:$0x3] }
 0x1e5   : > { %v537_v8 = vadd.f32 %v536_v7, %v494_v3  ;;  %v538_v9 = vpop.f32.mrb[2].mxu1  ;;  %v754_v7 = vpop.permute.xlu0 %753 }
 0x1e6   : > { %1702 = vtanh.f32 %v535_v6  ;;  %v539_v10 = vpop.f32.mrb[3].mxu1  ;;  %v1601_v6 = vld [vmem:[%s2145_s6 + $0x2] sm:$0x3] }
 0x1e7   : > { %1704 = vtanh.f32 %v537_v8 }
 0x1eb   : > { %v587_v12 = vpop.f32.mrb[4].mxu1 }
 0x1ec   : > { %v588_v13 = vadd.f32 %v587_v12, %v548_v11  ;;  %v589_v14 = vpop.f32.mrb[5].mxu1 }
 0x1ed   : > { %v590_v15 = vadd.f32 %v589_v14, %v548_v11  ;;  %v591_v16 = vpop.f32.mrb[6].mxu1 }
 0x1ee   : > { %v592_v17 = vpop.f32.mrb[7].mxu1 }
 0x1ef   : > { %v605_v18 = vcombine.low %v588_v13, %v590_v15 }
 0x1f0   : > { %v2000_v19 = vpop.eup %1702 }
 0x1f1   : > { %v2002_v20 = vpop.eup %1704  ;;  %v594_v21 = vmul.f32 1.442695, %v2000_v19  ;;  %v609_v11 = vsel %vm608_vm3, %v2000_v19, 0.0 }
 0x1f2   : > { %v596_v22 = vmul.f32 1.442695, %v2002_v20  ;;  %v616_v14 = vsel %vm608_vm3, %v2002_v20, 0.0  ;;  %v610_v16 = vrot.slane %v609_v11, 4 }
 0x1f3   : > { %1706 = vpow2.f32 %v594_v21  ;;  %v617_v17 = vrot.slane %v616_v14, 4 }
 0x1f4   : > { %1708 = vpow2.f32 %v596_v22  ;;  %v611_v22 = vadd.f32 %v610_v16, %v609_v11 }
 0x1fd   : > { %v1707_v23 = vpop.eup %1706 }
 0x1fe   : > { %v1709_v24 = vpop.eup %1708 }
 0x1ff   : > { %v600_v26 = vcombine.low %v1707_v23, %v1709_v24 }
 0x201   : > { %v602_v27 = vmul.f32 %v600_v26, %v366_v25  ;;  %v618_v25 = vadd.f32 %v617_v17, %v616_v14 }
 0x203   : > { %v2011_v28 = vadd.f32 %v605_v18, %v602_v27  ;;  %v809_v18 = vpop.permute.xlu1 %808 }
 0x205   : > { %v631_v29 = vcombine.high %v2011_v28, %v2011_v28  ;;  %v633_v30 = vpack.c.bf16 %v2011_v28, %v2011_v28 }
 0x207   : > { %v634_v31 = vpack.c.bf16 %v631_v29, %v631_v29  ;;  %v677_v32 = vsel %vm417_vm0, %v633_v30, 0 }
 0x209   : > { %1595 = vmatprep.subr.msk.bf16.mxu0 %vm417_vm0, %v634_v31  ;;  %v612_v31 = vrot.slane %v611_v22, 2 }
 0x20a   : > { %683 = vmatpush1.bf16.msra.mxu0 %v677_v32 }
 0x20d   : > { %1596 = vmatmul.mubr.msk.bf16.vlgmr.msra.gmra.mrb[8].mxu0 %vm410_vm1, %v1680_v33  ;;  %v619_v33 = vrot.slane %v618_v25, 2 }
 0x20e   : > { %724 = vmatprep.mubr.bf16.mxu0 %v1806_v0 }
 0x215   : > { %1597 = vmatmul.mubr.msk.bf16.gmra.mrb[12].mxu0 %vm410_vm1, %v1681_v34 }
 0x216   : > { %974 = vmatprep.mubr.bf16.mxu0 %v1806_v0 }
 0x2e0   : > { %v716_v36 = vpop.f32.mrb[8].mxu0 }
 0x2e1   : > { %v717_v37 = vadd.f32 %v716_v36, %v643_v35  ;;  %v718_v38 = vpop.f32.mrb[9].mxu0 }
 0x2e2   : > { %v719_v40 = vadd.f32 %v718_v38, %v643_v35  ;;  %v720_v41 = vpop.f32.mrb[10].mxu0 }
 0x2e3   : > { %1710 = vtanh.f32 %v717_v37  ;;  %v721_v42 = vadd.f32 %v720_v41, %v648_v39  ;;  %v722_v43 = vpop.f32.mrb[11].mxu0  ;;  %v620_v41 = vadd.f32 %v619_v33, %v618_v25 }
 0x2e4   : > { %1712 = vtanh.f32 %v719_v40  ;;  %v723_v44 = vadd.f32 %v722_v43, %v648_v39  ;;  %v613_v39 = vadd.f32 %v612_v31, %v611_v22 }
 0x2e5   : > { %1714 = vtanh.f32 %v721_v42 }
 0x2e6   : > { %1716 = vtanh.f32 %v723_v44 }
 0x2e8   : > { %v726_v46 = vpop.f32.mrb[12].mxu0 }
 0x2e9   : > { %v727_v47 = vadd.f32 %v726_v46, %v653_v45  ;;  %v728_v48 = vpop.f32.mrb[13].mxu0 }
 0x2ea   : > { %v729_v50 = vadd.f32 %v728_v48, %v653_v45  ;;  %v730_v51 = vpop.f32.mrb[14].mxu0  ;;  %v614_v45 = vrot.slane %v613_v39, 1 }
 0x2eb   : > { %1718 = vtanh.f32 %v727_v47  ;;  %v731_v52 = vadd.f32 %v730_v51, %v658_v49  ;;  %v732_v53 = vpop.f32.mrb[15].mxu0  ;;  %v621_v47 = vrot.slane %v620_v41, 1 }
 0x2ec   : > { %1720 = vtanh.f32 %v729_v50  ;;  %v733_v54 = vadd.f32 %v732_v53, %v658_v49  ;;  %v615_v51 = vadd.f32 %v614_v45, %v613_v39  ;;  %v1620_v39 = vld [vmem:[%s2145_s6 + $0x4] sm:$0x3] }
 0x2ed   : > { %v1711_v55 = vpop.eup %1710  ;;  %1722 = vtanh.f32 %v731_v52 }
 0x2ee   : > { %v1713_v56 = vpop.eup %1712  ;;  %1724 = vtanh.f32 %v733_v54  ;;  %v622_v54 = vadd.f32 %v621_v47, %v620_v41 }
 0x2ef   : > { %v1715_v57 = vpop.eup %1714 }
 0x2f0   : > { %v1717_v58 = vpop.eup %1716  ;;  %v743_v59 = vpack.c.bf16 %v1715_v57, %v1711_v55 }
 0x2f1   : > { %v744_v60 = vpack.c.bf16 %v1717_v58, %v1713_v56 }
 0x2f3   : > { %759 = vmatprep.subr.bf16.mxu1 %v744_v60 }
 0x2f4   : > { %760 = vmatpush1.bf16.msra.mxu1 %v743_v59 }
 0x2f5   : > { %v1719_v61 = vpop.eup %1718 }
 0x2f6   : > { %v1721_v62 = vpop.eup %1720 }
 0x2f7   : > { %v1723_v63 = vpop.eup %1722 }
 0x2f8   : > { %v1725_v1 = vpop.eup %1724  ;;  %v745_v2 = vpack.c.bf16 %v1723_v63, %v1719_v61 }
 0x2f9   : > { %v746_v3 = vpack.c.bf16 %v1725_v1, %v1721_v62 }
 0x2fb   : > { %761 = vmatprep.subr.bf16.mxu1 %v746_v3 }
 0x2fc   : > { %762 = vmatpush1.bf16.msra.mxu1 %v745_v2 }
 0x2fd   : > { %814 = vmatprep.subr.bf16.mxu1 %v744_v60 }
 0x2ff   : > { %1600 = vmatmul.mubr.msk.bf16.vlgmr.msra.gmra.mrb[8].mxu1 %vm496_vm2, %v1598_v4  ;;  %v903_v4 = vpop.permute.xlu0 %902 }
 0x300   : > { %815 = vmatpush1.bf16.msra.mxu1 %v743_v59  ;;  %846 = vmatprep.mubr.bf16.mxu1 %v1806_v0 }
 0x301   : > { %816 = vmatprep.subr.bf16.mxu1 %v746_v3  ;;  %v1682_v3 = vld [vmem:[%s2141_s2 + $0x20] sm:$0xff]  }
 0x304   : > { %817 = vmatpush1.bf16.msra.mxu1 %v745_v2 }
 0x307   : > { %1603 = vmatmul.mubr.msk.bf16.vlgmr.msra.gmra.mrb[12].mxu1 %vm496_vm2, %v1601_v6 }
 0x308   : > { %1051 = vmatprep.mubr.bf16.mxu1 %v1806_v0 }
 0x3d2   : > { %v793_v8 = vpop.f32.mrb[8].mxu1 }
 0x3d3   : > { %v794_v9 = vadd.f32 %v793_v8, %v754_v7  ;;  %v795_v10 = vpop.f32.mrb[9].mxu1 }
 0x3d4   : > { %v796_v12 = vadd.f32 %v795_v10, %v754_v7  ;;  %v797_v13 = vpop.f32.mrb[10].mxu1 }
 0x3d5   : > { %1726 = vtanh.f32 %v794_v9  ;;  %v798_v15 = vpop.f32.mrb[11].mxu1  ;;  %v908_v9 = vpop.permute.xlu1 %907 }
 0x3d6   : > { %1728 = vtanh.f32 %v796_v12  ;;  %v913_v15 = vpop.permute.xlu0 %912 }
 0x3da   : > { %v848_v21 = vpop.f32.mrb[12].mxu1 }
 0x3db   : > { %v849_v23 = vadd.f32 %v848_v21, %v809_v18  ;;  %v850_v24 = vpop.f32.mrb[13].mxu1  ;;  %v918_v21 = vpop.permute.xlu1 %917 }
 0x3dc   : > { %v851_v26 = vadd.f32 %v850_v24, %v809_v18  ;;  %v852_v27 = vpop.f32.mrb[14].mxu1 }
 0x3dd   : > { %v853_v29 = vpop.f32.mrb[15].mxu1 }
 0x3de   : > { %v866_v19 = vcombine.low %v849_v23, %v851_v26 }
 0x3df   : > { %v1727_v30 = vpop.eup %1726  ;;  %v1069_v47 = vpop.permute.xlu1 %1068 }
 0x3e0   : > { %v1729_v32 = vpop.eup %1728  ;;  %v855_v20 = vmul.f32 1.442695, %v1727_v30  ;;  %v869_v34 = vsel %vm608_vm3, %v1727_v30, 0.0 }
 0x3e1   : > { %v870_v35 = vrot.slane %v869_v34, 4  ;;  %v857_v36 = vmul.f32 1.442695, %v1729_v32  ;;  %v876_v37 = vsel %vm608_vm3, %v1729_v32, 0.0 }
 0x3e2   : > { %1730 = vpow2.f32 %v855_v20  ;;  %v877_v38 = vrot.slane %v876_v37, 4 }
 0x3e3   : > { %v871_v40 = vadd.f32 %v870_v35, %v869_v34  ;;  %1732 = vpow2.f32 %v857_v36 }
 0x3e4   : > { %v878_v42 = vadd.f32 %v877_v38, %v876_v37  ;;  %v1617_v38 = vld [vmem:[%s2143_s4 + $0x4] sm:$0x3] }
 0x3e5   : > { %v872_v43 = vrot.slane %v871_v40, 2 }
 0x3e6   : > { %v879_v44 = vrot.slane %v878_v42, 2 }
 0x3e7   : > { %v873_v46 = vadd.f32 %v872_v43, %v871_v40  ;;  %v1014_v40 = vpop.permute.xlu0 %1013 }
 0x3e8   : > { %v880_v48 = vadd.f32 %v879_v44, %v878_v42 }
 0x3e9   : > { %v874_v49 = vrot.slane %v873_v46, 1 }
 0x3ea   : > { %v881_v50 = vrot.slane %v880_v48, 1 }
 0x3eb   : > { %v875_v52 = vadd.f32 %v874_v49, %v873_v46 }
 0x3ec   : > { %v1731_v53 = vpop.eup %1730  ;;  %v882_v55 = vadd.f32 %v881_v50, %v880_v48 }
 0x3ed   : > { %v1733_v56 = vpop.eup %1732  ;;  %v2045_v57 = vadd.f32 %v875_v52, %v615_v51 }
 0x3ee   : > { %v2047_v58 = vadd.f32 %v882_v55, %v622_v54  ;;  %v861_v59 = vcombine.low %v1731_v53, %v1733_v56 }
 0x3f0   : > { %v863_v60 = vmul.f32 %v861_v59, %v1912_v5  ;;  %v1683_v5 = vld [vmem:[%s2141_s2 + $0x28] sm:$0xff]  }
 0x3f2   : > { %v2050_v61 = vadd.f32 %v866_v19, %v863_v60 }
 0x3f4   : > { %v891_v62 = vcombine.high %v2050_v61, %v2050_v61  ;;  %v893_v63 = vpack.c.bf16 %v2050_v61, %v2050_v61 }
 0x3f6   : > { %v894_v1 = vpack.c.bf16 %v891_v62, %v891_v62  ;;  %v937_v2 = vsel %vm417_vm0, %v893_v63, 0 }
 0x3f8   : > { %1614 = vmatprep.subr.msk.bf16.mxu0 %vm417_vm0, %v894_v1 }
 0x3f9   : > { %943 = vmatpush1.bf16.msra.mxu0 %v937_v2 }
 0x3fc   : > { %1615 = vmatmul.mubr.msk.bf16.vlgmr.msra.gmra.mrb[16].mxu0 %vm410_vm1, %v1682_v3 }
 0x3fd   : > { %984 = vmatprep.mubr.bf16.mxu0 %v1806_v0 }
 0x404   : > { %1616 = vmatmul.mubr.msk.bf16.gmra.mrb[20].mxu0 %vm410_vm1, %v1683_v5 }
 0x405   : > { %1234 = vmatprep.mubr.bf16.mxu0 %v1806_v0 }
 0x4cf   : > { %v976_v6 = vpop.f32.mrb[16].mxu0 }
 0x4d0   : > { %v977_v7 = vadd.f32 %v976_v6, %v903_v4  ;;  %v978_v8 = vpop.f32.mrb[17].mxu0 }
 0x4d1   : > { %v979_v10 = vadd.f32 %v978_v8, %v903_v4  ;;  %v980_v11 = vpop.f32.mrb[18].mxu0 }
 0x4d2   : > { %1734 = vtanh.f32 %v977_v7  ;;  %v981_v12 = vadd.f32 %v980_v11, %v908_v9  ;;  %v982_v13 = vpop.f32.mrb[19].mxu0 }
 0x4d3   : > { %1736 = vtanh.f32 %v979_v10  ;;  %v983_v14 = vadd.f32 %v982_v13, %v908_v9 }
 0x4d4   : > { %1738 = vtanh.f32 %v981_v12 }
 0x4d5   : > { %1740 = vtanh.f32 %v983_v14 }
 0x4d7   : > { %v986_v16 = vpop.f32.mrb[20].mxu0 }
 0x4d8   : > { %v987_v17 = vadd.f32 %v986_v16, %v913_v15  ;;  %v988_v18 = vpop.f32.mrb[21].mxu0 }
 0x4d9   : > { %v989_v22 = vadd.f32 %v988_v18, %v913_v15  ;;  %v990_v23 = vpop.f32.mrb[22].mxu0 }
 0x4da   : > { %1742 = vtanh.f32 %v987_v17  ;;  %v991_v24 = vadd.f32 %v990_v23, %v918_v21  ;;  %v992_v25 = vpop.f32.mrb[23].mxu0 }
 0x4db   : > { %1744 = vtanh.f32 %v989_v22  ;;  %v993_v26 = vadd.f32 %v992_v25, %v918_v21  ;;  %v1163_v25 = vpop.permute.xlu0 %1162 }
 0x4dc   : > { %v1735_v27 = vpop.eup %1734  ;;  %1746 = vtanh.f32 %v991_v24 }
 0x4dd   : > { %v1737_v29 = vpop.eup %1736  ;;  %1748 = vtanh.f32 %v993_v26 }
 0x4de   : > { %v1739_v19 = vpop.eup %1738 }
 0x4df   : > { %v1741_v30 = vpop.eup %1740  ;;  %v1003_v31 = vpack.c.bf16 %v1739_v19, %v1735_v27  ;;  %v1168_v19 = vpop.permute.xlu1 %1167 }
 0x4e0   : > { %v1004_v32 = vpack.c.bf16 %v1741_v30, %v1737_v29 }
 0x4e2   : > { %1019 = vmatprep.subr.bf16.mxu1 %v1004_v32 }
 0x4e3   : > { %1020 = vmatpush1.bf16.msra.mxu1 %v1003_v31 }
 0x4e4   : > { %v1743_v33 = vpop.eup %1742 }
 0x4e5   : > { %v1745_v20 = vpop.eup %1744 }
 0x4e6   : > { %v1747_v34 = vpop.eup %1746 }
 0x4e7   : > { %v1749_v35 = vpop.eup %1748  ;;  %v1005_v36 = vpack.c.bf16 %v1747_v34, %v1743_v33  ;;  %v1173_v34 = vpop.permute.xlu0 %1172 }
 0x4e8   : > { %v1006_v37 = vpack.c.bf16 %v1749_v35, %v1745_v20 }
 0x4ea   : > { %1021 = vmatprep.subr.bf16.mxu1 %v1006_v37 }
 0x4eb   : > { %1022 = vmatpush1.bf16.msra.mxu1 %v1005_v36 }
 0x4ec   : > { %1074 = vmatprep.subr.bf16.mxu1 %v1004_v32 }
 0x4ee   : > { %1619 = vmatmul.mubr.msk.bf16.vlgmr.msra.gmra.mrb[16].mxu1 %vm496_vm2, %v1617_v38  ;;  %v1178_v38 = vpop.permute.xlu1 %1177 }
 0x4ef   : > { %1075 = vmatpush1.bf16.msra.mxu1 %v1003_v31  ;;  %1106 = vmatprep.mubr.bf16.mxu1 %v1806_v0 }
 0x4f0   : > { %1076 = vmatprep.subr.bf16.mxu1 %v1006_v37 }
 0x4f3   : > { %1077 = vmatpush1.bf16.msra.mxu1 %v1005_v36 }
 0x4f6   : > { %1622 = vmatmul.mubr.msk.bf16.vlgmr.msra.gmra.mrb[20].mxu1 %vm496_vm2, %v1620_v39 }
 0x4f7   : > { %1311 = vmatprep.mubr.bf16.mxu1 %v1806_v0 }
 0x5c1   : > { %v1053_v41 = vpop.f32.mrb[16].mxu1 }
 0x5c2   : > { %v1054_v42 = vadd.f32 %v1053_v41, %v1014_v40  ;;  %v1055_v43 = vpop.f32.mrb[17].mxu1 }
 0x5c3   : > { %v1056_v44 = vadd.f32 %v1055_v43, %v1014_v40  ;;  %v1057_v45 = vpop.f32.mrb[18].mxu1 }
 0x5c4   : > { %1750 = vtanh.f32 %v1054_v42  ;;  %v1058_v46 = vpop.f32.mrb[19].mxu1 }
 0x5c5   : > { %1752 = vtanh.f32 %v1056_v44 }
 0x5c9   : > { %v1108_v48 = vpop.f32.mrb[20].mxu1 }
 0x5ca   : > { %v1109_v49 = vadd.f32 %v1108_v48, %v1069_v47  ;;  %v1110_v50 = vpop.f32.mrb[21].mxu1 }
 0x5cb   : > { %v1111_v51 = vadd.f32 %v1110_v50, %v1069_v47  ;;  %v1112_v52 = vpop.f32.mrb[22].mxu1 }
 0x5cc   : > { %v1113_v53 = vpop.f32.mrb[23].mxu1 }
 0x5cd   : > { %v1126_v54 = vcombine.low %v1109_v49, %v1111_v51 }
 0x5ce   : > { %v1751_v55 = vpop.eup %1750 }
 0x5cf   : > { %v1753_v56 = vpop.eup %1752  ;;  %v1115_v59 = vmul.f32 1.442695, %v1751_v55  ;;  %v1129_v60 = vsel %vm608_vm3, %v1751_v55, 0.0 }
 0x5d0   : > { %v1130_v62 = vrot.slane %v1129_v60, 4  ;;  %v1117_v63 = vmul.f32 1.442695, %v1753_v56  ;;  %v1136_v1 = vsel %vm608_vm3, %v1753_v56, 0.0  ;;  %v1636_v56 = vld [vmem:[%s2143_s4 + $0x6] sm:$0x3] }
 0x5d1   : > { %1754 = vpow2.f32 %v1115_v59  ;;  %v1137_v2 = vrot.slane %v1136_v1, 4  ;;  %v1639_v59 = vld [vmem:[%s2145_s6 + $0x6] sm:$0x3] }
 0x5d2   : > { %v1131_v3 = vadd.f32 %v1130_v62, %v1129_v60  ;;  %1756 = vpow2.f32 %v1117_v63  ;;  %v1274_v60 = vpop.permute.xlu0 %1273 }
 0x5d3   : > { %v1138_v5 = vadd.f32 %v1137_v2, %v1136_v1 }
 0x5d4   : > { %v1132_v4 = vrot.slane %v1131_v3, 2 }
 0x5d5   : > { %v1139_v6 = vrot.slane %v1138_v5, 2 }
 0x5d6   : > { %v1133_v7 = vadd.f32 %v1132_v4, %v1131_v3  ;;  %v1329_v4 = vpop.permute.xlu1 %1328 }
 0x5d7   : > { %v1140_v8 = vadd.f32 %v1139_v6, %v1138_v5 }
 0x5d8   : > { %v1134_v9 = vrot.slane %v1133_v7, 1 }
 0x5d9   : > { %v1141_v10 = vrot.slane %v1140_v8, 1 }
 0x5da   : > { %v1135_v11 = vadd.f32 %v1134_v9, %v1133_v7 }
 0x5db   : > { %v1755_v12 = vpop.eup %1754  ;;  %v1142_v13 = vadd.f32 %v1141_v10, %v1140_v8 }
 0x5dc   : > { %v1757_v14 = vpop.eup %1756  ;;  %v2082_v15 = vadd.f32 %v1135_v11, %v2045_v57 }
 0x5dd   : > { %v2085_v16 = vadd.f32 %v1142_v13, %v2047_v58  ;;  %v1121_v17 = vcombine.low %v1755_v12, %v1757_v14  ;;  %v1684_v58 = vld [vmem:[%s2141_s2 + $0x30] sm:$0xff]  }
 0x5df   : > { %v1123_v18 = vmul.f32 %v1121_v17, %v2011_v28  ;;  %v1685_v28 = vld [vmem:[%s2141_s2 + $0x38] sm:$0xff]  }
 0x5e1   : > { %v1128_v21 = vadd.f32 %v1126_v54, %v1123_v18 }
 0x5e3   : > { %v1151_v22 = vcombine.high %v1128_v21, %v1128_v21  ;;  %v1153_v23 = vpack.c.bf16 %v1128_v21, %v1128_v21  ;;  %1642 = vst [vmem:[%s2088_s19 + $0x8] sm:$0xff] %v1128_v21 }
 0x5e5   : > { %v1154_v24 = vpack.c.bf16 %v1151_v22, %v1151_v22  ;;  %v1197_v57 = vsel %vm417_vm0, %v1153_v23, 0 }
 0x5e7   : > { %1633 = vmatprep.subr.msk.bf16.mxu0 %vm417_vm0, %v1154_v24 }
 0x5e8   : > { %1203 = vmatpush1.bf16.msra.mxu0 %v1197_v57 }
 0x5eb   : > { %1634 = vmatmul.mubr.msk.bf16.vlgmr.msra.gmra.mrb[24].mxu0 %vm410_vm1, %v1684_v58 }
 0x5ec   : > { %1244 = vmatprep.mubr.bf16.mxu0 %v1806_v0 }
 0x5f3   : > { %1635 = vmatmul.mubr.msk.bf16.gmra.mrb[28].mxu0 %vm410_vm1, %v1685_v28 }
 0x6be   : > { %v1236_v26 = vpop.f32.mrb[24].mxu0 }
 0x6bf   : > { %v1237_v27 = vadd.f32 %v1236_v26, %v1163_v25  ;;  %v1238_v29 = vpop.f32.mrb[25].mxu0 }
 0x6c0   : > { %v1239_v30 = vadd.f32 %v1238_v29, %v1163_v25  ;;  %v1240_v31 = vpop.f32.mrb[26].mxu0  ;;  %v1807_v25 = vmov 1966171168  }
 0x6c1   : > { %1758 = vtanh.f32 %v1237_v27  ;;  %v1241_v32 = vadd.f32 %v1240_v31, %v1168_v19  ;;  %v1242_v33 = vpop.f32.mrb[27].mxu0  ;;  %v1412_v26 = vunpack.c.l.s4 %v1807_v25  ;;  %v1414_v27 = vlaneseq }
 0x6c2   : > { %1760 = vtanh.f32 %v1239_v30  ;;  %v1243_v20 = vadd.f32 %v1242_v33, %v1168_v19 }
 0x6c3   : > { %1762 = vtanh.f32 %v1241_v32  ;;  %v1413_v32 = vunpack.c.0.s8 %v1412_v26  ;;  %v1415_v33 = vshrl.u32 %v1414_v27, 7  ;;  %vm1428_vm4 = vcmp.lt.s32.totalorder %v1414_v27, 256 }
 0x6c4   : > { %1764 = vtanh.f32 %v1243_v20 }
 0x6c6   : > { %v1246_v35 = vpop.f32.mrb[28].mxu0 }
 0x6c7   : > { %v1247_v36 = vadd.f32 %v1246_v35, %v1173_v34  ;;  %v1248_v37 = vpop.f32.mrb[29].mxu0 }
 0x6c8   : > { %v1249_v39 = vadd.f32 %v1248_v37, %v1173_v34  ;;  %v1250_v40 = vpop.f32.mrb[30].mxu0 }
 0x6c9   : > { %1766 = vtanh.f32 %v1247_v36  ;;  %v1251_v41 = vadd.f32 %v1250_v40, %v1178_v38  ;;  %v1252_v42 = vpop.f32.mrb[31].mxu0 }
 0x6ca   : > { %1768 = vtanh.f32 %v1249_v39  ;;  %v1253_v43 = vadd.f32 %v1252_v42, %v1178_v38  ;;  %v1416_v39 = vsub.s32 %v1413_v32, %v1415_v33 }
 0x6cb   : > { %v1759_v44 = vpop.eup %1758  ;;  %1770 = vtanh.f32 %v1251_v41 }
 0x6cc   : > { %v1761_v45 = vpop.eup %1760  ;;  %1772 = vtanh.f32 %v1253_v43 }
 0x6cd   : > { %v1763_v46 = vpop.eup %1762 }
 0x6ce   : > { %v1765_v47 = vpop.eup %1764  ;;  %v1263_v48 = vpack.c.bf16 %v1763_v46, %v1759_v44 }
 0x6cf   : > { %v1264_v49 = vpack.c.bf16 %v1765_v47, %v1761_v45 }
 0x6d1   : > { %1279 = vmatprep.subr.bf16.mxu1 %v1264_v49 }
 0x6d2   : > { %1280 = vmatpush1.bf16.msra.mxu1 %v1263_v48 }
 0x6d3   : > { %v1767_v50 = vpop.eup %1766 }
 0x6d4   : > { %v1769_v51 = vpop.eup %1768 }
 0x6d5   : > { %v1771_v52 = vpop.eup %1770 }
 0x6d6   : > { %v1773_v53 = vpop.eup %1772  ;;  %v1265_v54 = vpack.c.bf16 %v1771_v52, %v1767_v50 }
 0x6d7   : > { %v1266_v55 = vpack.c.bf16 %v1773_v53, %v1769_v51 }
 0x6d9   : > { %1281 = vmatprep.subr.bf16.mxu1 %v1266_v55 }
 0x6da   : > { %1282 = vmatpush1.bf16.msra.mxu1 %v1265_v54 }
 0x6db   : > { %1334 = vmatprep.subr.bf16.mxu1 %v1264_v49 }
 0x6dd   : > { %1638 = vmatmul.mubr.msk.bf16.vlgmr.msra.gmra.mrb[24].mxu1 %vm496_vm2, %v1636_v56 }
 0x6de   : > { %1335 = vmatpush1.bf16.msra.mxu1 %v1263_v48  ;;  %1366 = vmatprep.mubr.bf16.mxu1 %v1806_v0 }
 0x6df   : > { %1336 = vmatprep.subr.bf16.mxu1 %v1266_v55 }
 0x6e2   : > { %1337 = vmatpush1.bf16.msra.mxu1 %v1265_v54 }
 0x6e5   : > { %1641 = vmatmul.mubr.msk.bf16.vlgmr.msra.gmra.mrb[28].mxu1 %vm496_vm2, %v1639_v59 }
 0x7b0   : > { %v1313_v62 = vpop.f32.mrb[24].mxu1 }
 0x7b1   : > { %v1314_v63 = vadd.f32 %v1313_v62, %v1274_v60  ;;  %v1315_v1 = vpop.f32.mrb[25].mxu1 }
 0x7b2   : > { %v1316_v2 = vadd.f32 %v1315_v1, %v1274_v60  ;;  %v1317_v3 = vpop.f32.mrb[26].mxu1 }
 0x7b3   : > { %1774 = vtanh.f32 %v1314_v63  ;;  %v1318_v5 = vpop.f32.mrb[27].mxu1 }
 0x7b4   : > { %1776 = vtanh.f32 %v1316_v2 }
 0x7b8   : > { %v1368_v6 = vpop.f32.mrb[28].mxu1 }
 0x7b9   : > { %v1369_v0 = vadd.f32 %v1368_v6, %v1329_v4  ;;  %v1370_v7 = vpop.f32.mrb[29].mxu1 }
 0x7ba   : > { %v1371_v8 = vadd.f32 %v1370_v7, %v1329_v4  ;;  %v1372_v9 = vpop.f32.mrb[30].mxu1 }
 0x7bb   : > { %v1373_v10 = vpop.f32.mrb[31].mxu1 }
 0x7bc   : > { %v1386_v11 = vcombine.low %v1369_v0, %v1371_v8 }
 0x7bd   : > { %v1775_v12 = vpop.eup %1774 }
 0x7be   : > { %v1777_v13 = vpop.eup %1776  ;;  %v1375_v14 = vmul.f32 1.442695, %v1775_v12  ;;  %v1389_v17 = vsel %vm608_vm3, %v1775_v12, 0.0 }
 0x7bf   : > { %v1390_v18 = vrot.slane %v1389_v17, 4  ;;  %v1377_v21 = vmul.f32 1.442695, %v1777_v13  ;;  %v1396_v22 = vsel %vm608_vm3, %v1777_v13, 0.0 }
 0x7c0   : > { %1778 = vpow2.f32 %v1375_v14  ;;  %v1397_v23 = vrot.slane %v1396_v22, 4 }
 0x7c1   : > { %v1391_v24 = vadd.f32 %v1390_v18, %v1389_v17  ;;  %1780 = vpow2.f32 %v1377_v21 }
 0x7c2   : > { %v1398_v57 = vadd.f32 %v1397_v23, %v1396_v22 }
 0x7c3   : > { %v1392_v58 = vrot.slane %v1391_v24, 2 }
 0x7c4   : > { %v1399_v28 = vrot.slane %v1398_v57, 2 }
 0x7c5   : > { %v1393_v29 = vadd.f32 %v1392_v58, %v1391_v24 }
 0x7c6   : > { %v1400_v19 = vadd.f32 %v1399_v28, %v1398_v57 }
 0x7c7   : > { %v1394_v30 = vrot.slane %v1393_v29, 1 }
 0x7c8   : > { %v1401_v31 = vrot.slane %v1400_v19, 1 }
 0x7c9   : > { %v1395_v20 = vadd.f32 %v1394_v30, %v1393_v29 }
 0x7ca   : > { %v1779_v34 = vpop.eup %1778  ;;  %v1402_v35 = vadd.f32 %v1401_v31, %v1400_v19 }
 0x7cb   : > { %v1781_v36 = vpop.eup %1780  ;;  %v1403_v37 = vadd.f32 %v1395_v20, %v2082_v15 }
 0x7cc   : > { %v1404_v38 = vadd.f32 %v1402_v35, %v2085_v16  ;;  %v1381_v40 = vcombine.low %v1779_v34, %v1781_v36  ;;  %v1476_v16 = vld [vmem:[%s2088_s19 + $0x8] sm:$0xff] (%p1883_p4) }
 0x7cd   : > { %1477 = vst [vmem:[%s1444_s30 + $0x10] sm:$0xff] (%p1883_p4), %v1476_v16 }
 0x7ce   : > { %v1410_v41 = vcombine.low %v1403_v37, %v1404_v38  ;;  %v1383_v42 = vmul.f32 %v1381_v40, %v2050_v61  ;;  %1441 = sbr.rel (!%p1883_p4) target bundleno = 2011 (0x7db), region = 56 }
 0x7d0   : > { %v1417_v43 = vrot.slane %v1410_v41, %v1416_v39  ;;  %v1388_v44 = vadd.f32 %v1386_v11, %v1383_v42 }
 0x7d2   : > { %v1424_v45 = vrot.slane %v1417_v43, %v1416_v39  ;;  %1405 = vst [vmem:[%s2088_s19] sm:$0xff] %v1388_v44 }
 0x7d4   : > { %1430 = vst.msk [vmem:[%s362_s11] sm:$0x3] %vm1428_vm4, %v1424_v45 }
 0x7d9   : > { %v1474_v15 = vld [vmem:[%s2088_s19] sm:$0xff] }
 0x7da   : > { %1475 = vst [vmem:[%s1444_s30] sm:$0xff] %v1474_v15 }
 0x7db PF: > { %p17_p8 = scmp.ge.s32.totalorder %s1873_s13, 4   ;;  %s2150_s30 = smov %s1800_s10 }
 0x7dc   : > { %s2151_s10 = smov %s1881_s16  ;;  %s2152_s11 = smov %s1873_s13 }
 0x7dd   :  { %19 = sbr.rel (!%p17_p8) target bundleno = 2 (0x2), region = 154 }

</bundles_post_ra>
